<compile_context>
chip_gen: v5e
topology: v5e:2x2
jax: 0.10.0
libtpu: 0.0.40
codegen_flags: <defaults>
</compile_context>

<pallas_src>
import jax
import jax.numpy as jnp
from jax.experimental import pallas as pl
from jax.experimental.pallas import tpu as pltpu


def dqn_kernel(x0_ref, x1_ref, w1r0_ref, w1r1_ref, b1_ref,
               w2_ref, b2_ref, w3_ref, b3_ref, o_ref):
    # fc1 + ReLU: K=2 contraction done as two VPU broadcast-FMAs
    # (an MXU pass would be <2% utilized at K=2).
    h1 = x0_ref[...] * w1r0_ref[...] + x1_ref[...] * w1r1_ref[...] + b1_ref[...]
    h1 = jnp.maximum(h1, 0.0)                                   # (TB, 128) f32

    # fc2 + ReLU: f32 MXU matmul with f32 accumulation (not MXU-bound,
    # so f32 keeps parity with the PyTorch f32 module at negligible cost).
    h2 = jnp.dot(h1, w2_ref[...], preferred_element_type=jnp.float32)
    h2 = jnp.maximum(h2 + b2_ref[...], 0.0)                     # (TB, 128) f32

    # fc3: (TB,128) x (128,4) -> (TB,4), stored directly (16 B/row to HBM).
    out = jnp.dot(h2, w3_ref[...], preferred_element_type=jnp.float32)
    o_ref[...] = (out + b3_ref[...]).astype(o_ref.dtype)        # (TB, 4) f32


def _round_up(n, m):
    return (n + m - 1) // m * m


def _pick_tile(batch, tb_max=1024):
    """Batch tile: big tiles to amortize ~0.35 us/step grid overhead, but keep
    >= 2 grid steps for large batches so the 'parallel' axis can shard across
    both TensorCores on v7x."""
    tb_max = _round_up(tb_max, 8)
    rb = _round_up(batch, 8)
    if rb <= 512:
        return rb                      # one tile; splitting isn't worth a step
    return min(tb_max, _round_up((rb + 1) // 2, 8))


def init_params(key):
    # Deterministic init mimicking nn.Linear's uniform(-1/sqrt(fan_in), ...).
    ks = jax.random.split(key, 6)

    def linear(kw, kb, fan_in, fan_out):
        bound = 1.0 / jnp.sqrt(fan_in)
        w = jax.random.uniform(kw, (fan_in, fan_out), jnp.float32, -bound, bound)
        b = jax.random.uniform(kb, (1, fan_out), jnp.float32, -bound, bound)
        return w, b

    w1, b1 = linear(ks[0], ks[1], 2, 128)
    w2, b2 = linear(ks[2], ks[3], 128, 128)
    w3, b3 = linear(ks[4], ks[5], 128, 4)
    return (w1, b1, w2, b2, w3, b3)


def prepare_params(params):
    """Hoisted (once-per-update) weight prep: split w1 into its two rows for
    the fc1 VPU path.  No padding / dtype casts are needed anymore."""
    w1, b1, w2, b2, w3, b3 = params
    return (w1[0:1, :], w1[1:2, :], b1, w2, b2, w3, b3)


def dqn_forward(x, prepared, *, tb_max=1024):
    """x: (batch, 2) f32. Returns (batch, 4) f32 Q-values."""
    w1r0, w1r1, b1, w2, b2, w3, b3 = prepared
    batch = x.shape[0]
    hidden = w2.shape[0]          # 128
    out_dim = w3.shape[1]         # 4

    tb = _pick_tile(batch, tb_max)
    padded = _round_up(batch, tb)
    if padded != batch:
        x = jnp.pad(x, ((0, padded - batch), (0, 0)))

    # Pre-split x so the kernel never lane-slices a width-2 block.
    x0 = x[:, 0:1]
    x1 = x[:, 1:2]
    grid = (padded // tb,)

    def tile_map(i):
        return (i, 0)

    def const_map(i):
        return (0, 0)

    # Constant-index weights/biases: single-buffered (no point double-buffering
    # blocks whose index never changes).
    resident = pl.Buffered(1)

    out = pl.pallas_call(
        dqn_kernel,
        out_shape=jax.ShapeDtypeStruct((padded, out_dim), jnp.float32),
        grid=grid,
        in_specs=[
            pl.BlockSpec((tb, 1), tile_map),                                   # x col 0
            pl.BlockSpec((tb, 1), tile_map),                                   # x col 1
            pl.BlockSpec((1, hidden), const_map, pipeline_mode=resident),      # w1 row 0
            pl.BlockSpec((1, hidden), const_map, pipeline_mode=resident),      # w1 row 1
            pl.BlockSpec((1, hidden), const_map, pipeline_mode=resident),      # b1
            pl.BlockSpec((hidden, hidden), const_map, pipeline_mode=resident), # w2
            pl.BlockSpec((1, hidden), const_map, pipeline_mode=resident),      # b2
            pl.BlockSpec((hidden, out_dim), const_map, pipeline_mode=resident),# w3
            pl.BlockSpec((1, out_dim), const_map, pipeline_mode=resident),     # b3
        ],
        out_specs=pl.BlockSpec((tb, out_dim), tile_map),
        compiler_params=pltpu.CompilerParams(
            dimension_semantics=("parallel",),
        ),
    )(x0, x1, w1r0, w1r1, b1, w2, b2, w3, b3)

    return out[:batch]


def reference_forward(x, params):
    # Pure f32 reference matching the PyTorch module semantics.
    w1, b1, w2, b2, w3, b3 = params
    h1 = jnp.maximum(x @ w1 + b1, 0.0)
    h2 = jnp.maximum(h1 @ w2 + b2, 0.0)
    return h2 @ w3 + b3


if __name__ == "__main__":
    key = jax.random.PRNGKey(0)
    k_params, k_x1, k_x2 = jax.random.split(key, 3)
    params = init_params(k_params)
    prepared = prepare_params(params)

    # Small latency-style batch (typical DQN action selection), single tile.
    x_small = jax.random.normal(k_x1, (8, 2), dtype=jnp.float32)
    out_small = jax.block_until_ready(dqn_forward(x_small, prepared))
    ref_small = reference_forward(x_small, params)
    assert out_small.shape == (8, 4), out_small.shape
    assert jnp.allclose(out_small, ref_small, atol=2e-2, rtol=2e-2), \
        "small-batch mismatch vs reference"

    # Larger batch exercising batch padding + the multi-step 'parallel' grid.
    x_big = jax.random.normal(k_x2, (1000, 2), dtype=jnp.float32)
    out_big = jax.block_until_ready(dqn_forward(x_big, prepared))
    ref_big = reference_forward(x_big, params)
    assert out_big.shape == (1000, 4), out_big.shape
    assert jnp.allclose(out_big, ref_big, atol=2e-2, rtol=2e-2), \
        "large-batch mismatch vs reference"

    print("KERNEL_OK")
</pallas_src>

<mosaic_0001>
module attributes {stable_mosaic.version = 11 : i64} {
  func.func @dqn_kernel(%arg0: i32, %arg1: memref<8x1xf32, #tpu.memory_space<vmem>>, %arg2: memref<8x1xf32, #tpu.memory_space<vmem>>, %arg3: memref<1x128xf32, #tpu.memory_space<vmem>>, %arg4: memref<1x128xf32, #tpu.memory_space<vmem>>, %arg5: memref<1x128xf32, #tpu.memory_space<vmem>>, %arg6: memref<128x128xf32, #tpu.memory_space<vmem>>, %arg7: memref<1x128xf32, #tpu.memory_space<vmem>>, %arg8: memref<128x4xf32, #tpu.memory_space<vmem>>, %arg9: memref<1x4xf32, #tpu.memory_space<vmem>>, %arg10: memref<8x4xf32, #tpu.memory_space<vmem>>) attributes {dimension_semantics = [#tpu.dimension_semantics<parallel>], iteration_bounds = array<i64: 1>, scalar_prefetch = 0 : i64, scratch_operands = 0 : i64, tpu.core_type = #tpu.core_type<tc>, window_params = [{transform_indices = @transform_0, window_bounds = array<i64: 8, 1>}, {transform_indices = @transform_1, window_bounds = array<i64: 8, 1>}, {pipeline_mode = #tpu.pipeline_mode<synchronous>, transform_indices = @transform_2, window_bounds = array<i64: 1, 128>}, {pipeline_mode = #tpu.pipeline_mode<synchronous>, transform_indices = @transform_3, window_bounds = array<i64: 1, 128>}, {pipeline_mode = #tpu.pipeline_mode<synchronous>, transform_indices = @transform_4, window_bounds = array<i64: 1, 128>}, {pipeline_mode = #tpu.pipeline_mode<synchronous>, transform_indices = @transform_5, window_bounds = array<i64: 128, 128>}, {pipeline_mode = #tpu.pipeline_mode<synchronous>, transform_indices = @transform_6, window_bounds = array<i64: 1, 128>}, {pipeline_mode = #tpu.pipeline_mode<synchronous>, transform_indices = @transform_7, window_bounds = array<i64: 128, 4>}, {pipeline_mode = #tpu.pipeline_mode<synchronous>, transform_indices = @transform_8, window_bounds = array<i64: 1, 4>}, {transform_indices = @transform_9, window_bounds = array<i64: 8, 4>}]} {
    %c0 = arith.constant 0 : index
    %c0_0 = arith.constant 0 : index
    %0 = vector.load %arg1[%c0, %c0_0] : memref<8x1xf32, #tpu.memory_space<vmem>>, vector<8x1xf32>
    %c0_1 = arith.constant 0 : index
    %c0_2 = arith.constant 0 : index
    %1 = vector.load %arg3[%c0_1, %c0_2] : memref<1x128xf32, #tpu.memory_space<vmem>>, vector<1x128xf32>
    %2 = vector.broadcast %0 : vector<8x1xf32> to vector<8x128xf32>
    %3 = vector.broadcast %1 : vector<1x128xf32> to vector<8x128xf32>
    %4 = arith.mulf %2, %3 : vector<8x128xf32>
    %c0_3 = arith.constant 0 : index
    %c0_4 = arith.constant 0 : index
    %5 = vector.load %arg2[%c0_3, %c0_4] : memref<8x1xf32, #tpu.memory_space<vmem>>, vector<8x1xf32>
    %c0_5 = arith.constant 0 : index
    %c0_6 = arith.constant 0 : index
    %6 = vector.load %arg4[%c0_5, %c0_6] : memref<1x128xf32, #tpu.memory_space<vmem>>, vector<1x128xf32>
    %7 = vector.broadcast %5 : vector<8x1xf32> to vector<8x128xf32>
    %8 = vector.broadcast %6 : vector<1x128xf32> to vector<8x128xf32>
    %9 = arith.mulf %7, %8 : vector<8x128xf32>
    %10 = arith.addf %4, %9 : vector<8x128xf32>
    %c0_7 = arith.constant 0 : index
    %c0_8 = arith.constant 0 : index
    %11 = vector.load %arg5[%c0_7, %c0_8] : memref<1x128xf32, #tpu.memory_space<vmem>>, vector<1x128xf32>
    %12 = vector.broadcast %11 : vector<1x128xf32> to vector<8x128xf32>
    %13 = arith.addf %10, %12 : vector<8x128xf32>
    %cst = arith.constant 0.000000e+00 : f32
    %14 = vector.broadcast %cst : f32 to vector<8x128xf32>
    %15 = arith.maximumf %13, %14 : vector<8x128xf32>
    %c0_9 = arith.constant 0 : index
    %c0_10 = arith.constant 0 : index
    %16 = vector.load %arg6[%c0_9, %c0_10] : memref<128x128xf32, #tpu.memory_space<vmem>>, vector<128x128xf32>
    %cst_11 = arith.constant dense<0.000000e+00> : vector<8x128xf32>
    %17 = tpu.matmul %15, %16, %cst_11 {dimension_numbers = #tpu.dot_dimension_numbers<[1], [0], [0], [1], [0, 0, 1, 1], [], []>} : vector<8x128xf32>, vector<128x128xf32>, vector<8x128xf32> -> vector<8x128xf32>
    %c0_12 = arith.constant 0 : index
    %c0_13 = arith.constant 0 : index
    %18 = vector.load %arg7[%c0_12, %c0_13] : memref<1x128xf32, #tpu.memory_space<vmem>>, vector<1x128xf32>
    %19 = vector.broadcast %18 : vector<1x128xf32> to vector<8x128xf32>
    %20 = arith.addf %17, %19 : vector<8x128xf32>
    %cst_14 = arith.constant 0.000000e+00 : f32
    %21 = vector.broadcast %cst_14 : f32 to vector<8x128xf32>
    %22 = arith.maximumf %20, %21 : vector<8x128xf32>
    %c0_15 = arith.constant 0 : index
    %c0_16 = arith.constant 0 : index
    %23 = vector.load %arg8[%c0_15, %c0_16] : memref<128x4xf32, #tpu.memory_space<vmem>>, vector<128x4xf32>
    %cst_17 = arith.constant dense<0.000000e+00> : vector<8x4xf32>
    %24 = tpu.matmul %22, %23, %cst_17 {dimension_numbers = #tpu.dot_dimension_numbers<[1], [0], [0], [1], [0, 0, 1, 1], [], []>} : vector<8x128xf32>, vector<128x4xf32>, vector<8x4xf32> -> vector<8x4xf32>
    %c0_18 = arith.constant 0 : index
    %c0_19 = arith.constant 0 : index
    %25 = vector.load %arg9[%c0_18, %c0_19] : memref<1x4xf32, #tpu.memory_space<vmem>>, vector<1x4xf32>
    %26 = vector.broadcast %25 : vector<1x4xf32> to vector<8x4xf32>
    %27 = arith.addf %24, %26 : vector<8x4xf32>
    %c0_20 = arith.constant 0 : index
    %c0_21 = arith.constant 0 : index
    %28 = vector.load %arg10[%c0_20, %c0_21] : memref<8x4xf32, #tpu.memory_space<vmem>>, vector<8x4xf32>
    tpu.vector_store %arg10[%c0_20, %c0_21], %27 {strides = array<i32>} : memref<8x4xf32, #tpu.memory_space<vmem>>, vector<8x4xf32>,
    return
  }
  func.func @transform_0(%arg0: i32) -> (i32, i32) {
    %c0_i32 = arith.constant 0 : i32
    %c0_i32_0 = arith.constant 0 : i32
    return %arg0, %c0_i32 : i32, i32
  }
  func.func @transform_1(%arg0: i32) -> (i32, i32) {
    %c0_i32 = arith.constant 0 : i32
    %c0_i32_0 = arith.constant 0 : i32
    return %arg0, %c0_i32 : i32, i32
  }
  func.func @transform_2(%arg0: i32) -> (i32, i32) {
    %c0_i32 = arith.constant 0 : i32
    %c0_i32_0 = arith.constant 0 : i32
    %c0_i32_1 = arith.constant 0 : i32
    return %c0_i32, %c0_i32_0 : i32, i32
  }
  func.func @transform_3(%arg0: i32) -> (i32, i32) {
    %c0_i32 = arith.constant 0 : i32
    %c0_i32_0 = arith.constant 0 : i32
    %c0_i32_1 = arith.constant 0 : i32
    return %c0_i32, %c0_i32_0 : i32, i32
  }
  func.func @transform_4(%arg0: i32) -> (i32, i32) {
    %c0_i32 = arith.constant 0 : i32
    %c0_i32_0 = arith.constant 0 : i32
    %c0_i32_1 = arith.constant 0 : i32
    return %c0_i32, %c0_i32_0 : i32, i32
  }
  func.func @transform_5(%arg0: i32) -> (i32, i32) {
    %c0_i32 = arith.constant 0 : i32
    %c0_i32_0 = arith.constant 0 : i32
    %c0_i32_1 = arith.constant 0 : i32
    return %c0_i32, %c0_i32_0 : i32, i32
  }
  func.func @transform_6(%arg0: i32) -> (i32, i32) {
    %c0_i32 = arith.constant 0 : i32
    %c0_i32_0 = arith.constant 0 : i32
    %c0_i32_1 = arith.constant 0 : i32
    return %c0_i32, %c0_i32_0 : i32, i32
  }
  func.func @transform_7(%arg0: i32) -> (i32, i32) {
    %c0_i32 = arith.constant 0 : i32
    %c0_i32_0 = arith.constant 0 : i32
    %c0_i32_1 = arith.constant 0 : i32
    return %c0_i32, %c0_i32_0 : i32, i32
  }
  func.func @transform_8(%arg0: i32) -> (i32, i32) {
    %c0_i32 = arith.constant 0 : i32
    %c0_i32_0 = arith.constant 0 : i32
    %c0_i32_1 = arith.constant 0 : i32
    return %c0_i32, %c0_i32_0 : i32, i32
  }
  func.func @transform_9(%arg0: i32) -> (i32, i32) {
    %c0_i32 = arith.constant 0 : i32
    %c0_i32_0 = arith.constant 0 : i32
    return %arg0, %c0_i32 : i32, i32
  }
}

</mosaic_0001>

<bundles_post_ra>
// kernel: tpu_custom_call.1
= control target key start
LH: loop header
LB: loop body
LE: loop exit
PB: predicated region body
PF: predicated region fallthrough
CT: control target
= control target key end

     0   :  { %v155_v0 = vmov 0   ;;  %vm142_vm0 = vcmask 31744   ;;  %s326_s0 = inlined_call_operand.vmem [shape: f32[8,1], index: 0, kind: input, shape index: {}]   ;;  %s327_s5 = inlined_call_operand.vmem [shape: f32[128,128], index: 5, kind: input, shape index: {}]   ;;  %s328_s2 = inlined_call_operand.vmem [shape: f32[1,128], index: 2, kind: input, shape index: {}]   ;;  %s329_s1 = inlined_call_operand.vmem [shape: f32[8,1], index: 1, kind: input, shape index: {}]   ;;  %s330_s3 = inlined_call_operand.vmem [shape: f32[1,128], index: 3, kind: input, shape index: {}]   ;;  %s331_s4 = inlined_call_operand.vmem [shape: f32[1,128], index: 4, kind: input, shape index: {}]   ;;  %s332_s6 = inlined_call_operand.vmem [shape: f32[1,128], index: 6, kind: input, shape index: {}]   ;;  %s333_s7 = inlined_call_operand.vmem [shape: f32[128,4], index: 7, kind: input, shape index: {}]   ;;  %s334_s8 = inlined_call_operand.vmem [shape: f32[1,4], index: 8, kind: input, shape index: {}]   ;;  %s335_s9 = inlined_call_operand.vmem [shape: f32[8,4], index: 9, kind: output, shape index: {}]  }
   0x1   :  { %149 = vset.pattern.permute.xlu0 %v155_v0  ;;  %v32_v1 = vld [vmem:[%s326_s0] sm:$0xff]  ;;  %v76_v2 = vld [vmem:[%s327_s5 + $0x78] sm:$0xff]  ;;  %v75_v3 = vld [vmem:[%s327_s5 + $0x70] sm:$0xff] }
   0x2   :  { %36 = vperm.xlu0 %149, %v32_v1   ;;  %81 = vmatpush.msra.mxu0 %v76_v2  ;;  %v74_v4 = vld [vmem:[%s327_s5 + $0x68] sm:$0xff]  ;;  %v73_v5 = vld [vmem:[%s327_s5 + $0x60] sm:$0xff]  ;;  %v72_v7 = vld [vmem:[%s327_s5 + $0x58] sm:$0xff] }
   0x3   :  { %v43_v6 = vld [vmem:[%s329_s1] sm:$0xff]  ;;  %v71_v8 = vld [vmem:[%s327_s5 + $0x50] sm:$0xff]  ;;  %v70_v9 = vld [vmem:[%s327_s5 + $0x48] sm:$0xff] }
   0x4   :  { %82 = vmatpush.msra.mxu0 %v75_v3  ;;  %v69_v10 = vld [vmem:[%s327_s5 + $0x40] sm:$0xff]  ;;  %v68_v11 = vld [vmem:[%s327_s5 + $0x38] sm:$0xff]  ;;  %v67_v12 = vld [vmem:[%s327_s5 + $0x30] sm:$0xff] }
   0x5   :  { %v66_v13 = vld [vmem:[%s327_s5 + $0x28] sm:$0xff]  ;;  %v65_v14 = vld [vmem:[%s327_s5 + $0x20] sm:$0xff]  ;;  %v64_v15 = vld [vmem:[%s327_s5 + $0x18] sm:$0xff] }
   0x6   :  { %83 = vmatpush.msra.mxu0 %v74_v4  ;;  %v63_v16 = vld [vmem:[%s327_s5 + $0x10] sm:$0xff]  ;;  %v62_v17 = vld [vmem:[%s327_s5 + $0x8] sm:$0xff]  ;;  %v61_v18 = vld [vmem:[%s327_s5] sm:$0xff] }
   0x7   :  { %v117_v19 = vld [vmem:[%s333_s7 + $0x78] sm:$0xff]  ;;  %v116_v20 = vld [vmem:[%s333_s7 + $0x70] sm:$0xff]  ;;  %v115_v21 = vld [vmem:[%s333_s7 + $0x68] sm:$0xff] }
   0x8   :  { %84 = vmatpush.msra.mxu0 %v73_v5  ;;  %122 = vmatpush.msra.mxu1 %v117_v19  ;;  %v114_v22 = vld [vmem:[%s333_s7 + $0x60] sm:$0xff]  ;;  %v113_v23 = vld [vmem:[%s333_s7 + $0x58] sm:$0xff]  ;;  %v112_v24 = vld [vmem:[%s333_s7 + $0x50] sm:$0xff] }
   0x9   :  { %v111_v25 = vld [vmem:[%s333_s7 + $0x48] sm:$0xff]  ;;  %v110_v26 = vld [vmem:[%s333_s7 + $0x40] sm:$0xff]  ;;  %v109_v27 = vld [vmem:[%s333_s7 + $0x38] sm:$0xff] }
   0xa   :  { %47 = vperm.xlu0 %149, %v43_v6   ;;  %85 = vmatpush.msra.mxu0 %v72_v7  ;;  %v108_v29 = vld [vmem:[%s333_s7 + $0x30] sm:$0xff]  ;;  %v107_v30 = vld [vmem:[%s333_s7 + $0x28] sm:$0xff]  ;;  %v150_v31 = vld [vmem:[%s328_s2] ss:$0 sm:$0xff] }
   0xb   :  { %123 = vmatpush.msra.mxu1 %v116_v20  ;;  %v151_v32 = vld [vmem:[%s330_s3] ss:$0 sm:$0xff]  ;;  %v105_v34 = vld [vmem:[%s333_s7 + $0x18] sm:$0xff]  ;;  %v104_v42 = vld [vmem:[%s333_s7 + $0x10] sm:$0xff] }
   0xc   :  { %86 = vmatpush.msra.mxu0 %v71_v8  ;;  %v106_v33 = vld [vmem:[%s333_s7 + $0x20] sm:$0xff]  ;;  %v103_v43 = vld [vmem:[%s333_s7 + $0x8] sm:$0xff] }
   0xd   :  { %124 = vmatpush.msra.mxu1 %v115_v21  ;;  %v152_v38 = vld [vmem:[%s331_s4] ss:$0 sm:$0xff] }
   0xe   :  { %87 = vmatpush.msra.mxu0 %v70_v9  ;;  %v102_v44 = vld [vmem:[%s333_s7] sm:$0xff] }
   0xf   :  { %125 = vmatpush.msra.mxu1 %v114_v22  ;;  %v153_v45 = vld [vmem:[%s332_s6] ss:$0 sm:$0xff] }
  0x10   :  { %88 = vmatpush.msra.mxu0 %v69_v10  ;;  %v154_v49 = vld [vmem:[%s334_s8] ss:$0 sm:$0xff] }
  0x11   :  { %126 = vmatpush.msra.mxu1 %v113_v23 }
  0x12   :  { %89 = vmatpush.msra.mxu0 %v68_v11 }
  0x13   :  { %127 = vmatpush.msra.mxu1 %v112_v24 }
  0x14   :  { %90 = vmatpush.msra.mxu0 %v67_v12 }
  0x15   :  { %128 = vmatpush.msra.mxu1 %v111_v25 }
  0x16   :  { %91 = vmatpush.msra.mxu0 %v66_v13 }
  0x17   :  { %129 = vmatpush.msra.mxu1 %v110_v26 }
  0x18   :  { %92 = vmatpush.msra.mxu0 %v65_v14 }
  0x19   :  { %130 = vmatpush.msra.mxu1 %v109_v27 }
  0x1a   :  { %93 = vmatpush.msra.mxu0 %v64_v15 }
  0x1b   :  { %131 = vmatpush.msra.mxu1 %v108_v29 }
  0x1c   :  { %94 = vmatpush.msra.mxu0 %v63_v16 }
  0x1d   :  { %132 = vmatpush.msra.mxu1 %v107_v30 }
  0x1e   :  { %95 = vmatpush.msra.mxu0 %v62_v17 }
  0x1f   :  { %133 = vmatpush.msra.mxu1 %v106_v33 }
  0x20   :  { %96 = vmatpush.msra.mxu0 %v61_v18 }
  0x21   :  { %134 = vmatpush.msra.mxu1 %v105_v34 }
  0x23   :  { %135 = vmatpush.msra.mxu1 %v104_v42 }
  0x25   :  { %136 = vmatpush.msra.mxu1 %v103_v43 }
  0x27   :  { %137 = vmatpush.msra.mxu1 %v102_v44 }
  0x74   :  { %v37_v28 = vpop.permute.xlu0 %36 }
  0x75   :  { %v42_v36 = vmul.f32 %v150_v31, %v37_v28 }
  0x7c   :  { %v48_v35 = vpop.permute.xlu0 %47 }
  0x7d   :  { %v53_v37 = vmul.f32 %v151_v32, %v48_v35 }
  0x7f   :  { %v54_v39 = vadd.f32 %v53_v37, %v42_v36 }
  0x81   :  { %v59_v40 = vadd.f32 %v152_v38, %v54_v39 }
  0x83   :  { %v60_v41 = vmax.f32 %v59_v40, 0.0 }
  0x85   :  { %97 = vmatmul.f32.vlgmr.msra.gmra.mxu0 %v60_v41 }
 0x102   :  { %v98_v46 = vpop.f32.mrf.mxu0 }
 0x103   :  { %v99_v47 = vadd.f32 %v153_v45, %v98_v46 }
 0x105   :  { %v101_v48 = vmax.f32 %v99_v47, 0.0 }
 0x107   :  { %138 = vmatmul.f32.vlgmr.msra.gmra.mxu1 %v101_v48 }
 0x184   :  { %v139_v50 = vpop.f32.mrf.mxu1 }
 0x185   :  { %v140_v51 = vadd.f32 %v154_v49, %v139_v50 }
 0x187   :  { %143 = vst.msk [vmem:[%s335_s9] sm:$0xff] %vm142_vm0, %v140_v51 }

</bundles_post_ra>
